<compile_context>
chip_gen: v6e
topology: v6e:2x2x1
jax: 0.10.0
libtpu: 0.0.40
codegen_flags: <defaults>
</compile_context>

<pallas_src>
import jax
import jax.numpy as jnp
from jax import lax
from jax.experimental import pallas as pl
from jax.experimental.pallas import tpu as pltpu

BN_EPS = 1e-3  # momentum=0.01 is irrelevant for the forward pass; eps=0.001


def _round_up(x, m):
    return (x + m - 1) // m * m


def _fcnet_kernel(x_ref, w1_ref, b1_ref, w2_ref, b2_ref, o_ref):
    # Layer 1: (BN-folded) Linear -> ReLU -> Dropout(identity)
    h = jnp.dot(x_ref[...], w1_ref[...], preferred_element_type=jnp.float32)
    h = jnp.maximum(h + b1_ref[...], 0.0)
    # Layer 2: (BN-folded) Linear -> ReLU -> Dropout(identity)
    y = jnp.dot(h, w2_ref[...], preferred_element_type=jnp.float32)
    y = jnp.maximum(y + b2_ref[...], 0.0)
    o_ref[...] = y.astype(o_ref.dtype)


def fcnet_forward(x, params, *, block_b=1024):
    """Fused FCNet forward pass (eval semantics) as a batch-tiled Pallas kernel.

    x: (B, n_in) float32
    params: dict from init_fcnet_params (torch-style Linear + BatchNorm params).
    block_b: max rows per grid step (multiple of 8).
    """
    B, n_in = x.shape
    n_hidden = params["w1"].shape[1]
    n_out = params["w2"].shape[1]

    # ---- fold BatchNorm into the Linear layers (exact, done on tiny consts) ----
    s1 = params["g1"] * lax.rsqrt(params["v1"] + BN_EPS)            # (1, H)
    w1f = params["w1"] * s1                                          # (n_in, H)
    b1f = (params["b1"] - params["m1"]) * s1 + params["be1"]         # (1, H)

    s2 = params["g2"] * lax.rsqrt(params["v2"] + BN_EPS)             # (1, n_out)
    w2f = params["w2"] * s2                                          # (H, n_out)
    b2f = (params["b2"] - params["m2"]) * s2 + params["be2"]         # (1, n_out)

    # ---- pad feature dims to 128 lanes, batch to a multiple of the tile ----
    n_in_p = _round_up(n_in, 128)
    h_p = _round_up(n_hidden, 128)
    n_out_p = _round_up(n_out, 128)

    tb = min(_round_up(block_b, 8), _round_up(B, 8))
    b_pad = _round_up(B, tb)

    x_p = jnp.pad(x, ((0, b_pad - B), (0, n_in_p - n_in)))
    w1p = jnp.pad(w1f, ((0, n_in_p - n_in), (0, h_p - n_hidden)))
    b1p = jnp.pad(b1f, ((0, 0), (0, h_p - n_hidden)))
    w2p = jnp.pad(w2f, ((0, h_p - n_hidden), (0, n_out_p - n_out)))
    b2p = jnp.pad(b2f, ((0, 0), (0, n_out_p - n_out)))

    grid = (b_pad // tb,)

    # Weights/biases: full-array blocks, constant index_map -> VMEM-resident
    # across all grid steps.  Only x / out stream through the pipeline.
    const = lambda i: (0, 0)
    in_specs = [
        pl.BlockSpec((tb, n_in_p), lambda i: (i, 0)),   # x tile
        pl.BlockSpec((n_in_p, h_p), const),             # W1'
        pl.BlockSpec((1, h_p), const),                  # b1'
        pl.BlockSpec((h_p, n_out_p), const),            # W2'
        pl.BlockSpec((1, n_out_p), const),              # b2'
    ]
    out_spec = pl.BlockSpec((tb, n_out_p), lambda i: (i, 0))

    out_p = pl.pallas_call(
        _fcnet_kernel,
        out_shape=jax.ShapeDtypeStruct((b_pad, n_out_p), jnp.float32),
        grid=grid,
        in_specs=in_specs,
        out_specs=out_spec,
        compiler_params=pltpu.CompilerParams(
            dimension_semantics=("parallel",),      # split batch grid across TCs (v7x)
            vmem_limit_bytes=32 << 20,              # fits v7x's 64 MiB physical VMEM
        ),
    )(x_p, w1p, b1p, w2p, b2p)

    return out_p[:B, :n_out]


def init_fcnet_params(key, n_in, n_hidden, n_out):
    """Deterministic synthetic parameters (shapes match the torch module)."""
    ks = jax.random.split(key, 12)

    def lin(kw, kb, fan_in, fan_out):
        # torch.nn.Linear default init: U(-1/sqrt(fan_in), 1/sqrt(fan_in))
        bound = 1.0 / jnp.sqrt(fan_in)
        w = jax.random.uniform(kw, (fan_in, fan_out), jnp.float32, -bound, bound)
        b = jax.random.uniform(kb, (1, fan_out), jnp.float32, -bound, bound)
        return w, b

    w1, b1 = lin(ks[0], ks[1], n_in, n_hidden)
    w2, b2 = lin(ks[2], ks[3], n_hidden, n_out)

    # BatchNorm affine params / running stats (synthetic but deterministic,
    # independent keys per layer).
    def bn(kg, kb, km, kv, n):
        g = 1.0 + 0.1 * jax.random.normal(kg, (1, n), jnp.float32)
        be = 0.1 * jax.random.normal(kb, (1, n), jnp.float32)
        m = 0.1 * jax.random.normal(km, (1, n), jnp.float32)
        v = 1.0 + 0.1 * jax.random.uniform(kv, (1, n), jnp.float32)
        return g, be, m, v

    g1, be1, m1, v1 = bn(ks[4], ks[5], ks[6], ks[7], n_hidden)
    g2, be2, m2, v2 = bn(ks[8], ks[9], ks[10], ks[11], n_out)

    return dict(
        w1=w1, b1=b1, g1=g1, be1=be1, m1=m1, v1=v1,
        w2=w2, b2=b2, g2=g2, be2=be2, m2=m2, v2=v2,
    )


def fcnet_reference(x, p):
    """Pure-JAX reference (same eval-mode semantics) for verification."""
    h = x @ p["w1"] + p["b1"]
    h = (h - p["m1"]) / jnp.sqrt(p["v1"] + BN_EPS) * p["g1"] + p["be1"]
    h = jnp.maximum(h, 0.0)
    y = h @ p["w2"] + p["b2"]
    y = (y - p["m2"]) / jnp.sqrt(p["v2"] + BN_EPS) * p["g2"] + p["be2"]
    return jnp.maximum(y, 0.0)


if __name__ == "__main__":
    key = jax.random.PRNGKey(0)
    k_x, k_x2, k_p = jax.random.split(key, 3)

    N_IN, N_HIDDEN, N_OUT = 32, 128, 16   # default n_hidden=[128]
    params = init_fcnet_params(k_p, N_IN, N_HIDDEN, N_OUT)

    # Small batch (single grid step).
    x = jax.random.normal(k_x, (8, N_IN), jnp.float32)
    out = jax.block_until_ready(fcnet_forward(x, params))
    ref = fcnet_reference(x, params)
    assert out.shape == (8, N_OUT)
    assert jnp.allclose(out, ref, atol=1e-4, rtol=1e-4), "mismatch vs reference (B=8)"

    # Multi-tile batch (exercises the grid + partial-tile padding path).
    x2 = jax.random.normal(k_x2, (600, N_IN), jnp.float32)
    out2 = jax.block_until_ready(fcnet_forward(x2, params, block_b=256))
    ref2 = fcnet_reference(x2, params)
    assert out2.shape == (600, N_OUT)
    assert jnp.allclose(out2, ref2, atol=1e-4, rtol=1e-4), "mismatch vs reference (B=600)"

    print("KERNEL_OK")
</pallas_src>

<mosaic_0001>
module attributes {stable_mosaic.version = 11 : i64} {
  func.func @_fcnet_kernel(%arg0: i32, %arg1: memref<8x128xf32, #tpu.memory_space<vmem>>, %arg2: memref<128x128xf32, #tpu.memory_space<vmem>>, %arg3: memref<1x128xf32, #tpu.memory_space<vmem>>, %arg4: memref<128x128xf32, #tpu.memory_space<vmem>>, %arg5: memref<1x128xf32, #tpu.memory_space<vmem>>, %arg6: memref<8x128xf32, #tpu.memory_space<vmem>>) attributes {dimension_semantics = [#tpu.dimension_semantics<parallel>], iteration_bounds = array<i64: 1>, scalar_prefetch = 0 : i64, scratch_operands = 0 : i64, tpu.core_type = #tpu.core_type<tc>, window_params = [{transform_indices = @transform_0, window_bounds = array<i64: 8, 128>}, {pipeline_mode = #tpu.pipeline_mode<synchronous>, transform_indices = @transform_1, window_bounds = array<i64: 128, 128>}, {pipeline_mode = #tpu.pipeline_mode<synchronous>, transform_indices = @transform_2, window_bounds = array<i64: 1, 128>}, {pipeline_mode = #tpu.pipeline_mode<synchronous>, transform_indices = @transform_3, window_bounds = array<i64: 128, 128>}, {pipeline_mode = #tpu.pipeline_mode<synchronous>, transform_indices = @transform_4, window_bounds = array<i64: 1, 128>}, {transform_indices = @transform_5, window_bounds = array<i64: 8, 128>}]} {
    %c0 = arith.constant 0 : index
    %c0_0 = arith.constant 0 : index
    %0 = vector.load %arg1[%c0, %c0_0] : memref<8x128xf32, #tpu.memory_space<vmem>>, vector<8x128xf32>
    %c0_1 = arith.constant 0 : index
    %c0_2 = arith.constant 0 : index
    %1 = vector.load %arg2[%c0_1, %c0_2] : memref<128x128xf32, #tpu.memory_space<vmem>>, vector<128x128xf32>
    %cst = arith.constant dense<0.000000e+00> : vector<8x128xf32>
    %2 = tpu.matmul %0, %1, %cst {dimension_numbers = #tpu.dot_dimension_numbers<[1], [0], [0], [1], [0, 0, 1, 1], [], []>} : vector<8x128xf32>, vector<128x128xf32>, vector<8x128xf32> -> vector<8x128xf32>
    %c0_3 = arith.constant 0 : index
    %c0_4 = arith.constant 0 : index
    %3 = vector.load %arg3[%c0_3, %c0_4] : memref<1x128xf32, #tpu.memory_space<vmem>>, vector<1x128xf32>
    %4 = vector.broadcast %3 : vector<1x128xf32> to vector<8x128xf32>
    %5 = arith.addf %2, %4 : vector<8x128xf32>
    %cst_5 = arith.constant 0.000000e+00 : f32
    %6 = vector.broadcast %cst_5 : f32 to vector<8x128xf32>
    %7 = arith.maximumf %5, %6 : vector<8x128xf32>
    %c0_6 = arith.constant 0 : index
    %c0_7 = arith.constant 0 : index
    %8 = vector.load %arg4[%c0_6, %c0_7] : memref<128x128xf32, #tpu.memory_space<vmem>>, vector<128x128xf32>
    %cst_8 = arith.constant dense<0.000000e+00> : vector<8x128xf32>
    %9 = tpu.matmul %7, %8, %cst_8 {dimension_numbers = #tpu.dot_dimension_numbers<[1], [0], [0], [1], [0, 0, 1, 1], [], []>} : vector<8x128xf32>, vector<128x128xf32>, vector<8x128xf32> -> vector<8x128xf32>
    %c0_9 = arith.constant 0 : index
    %c0_10 = arith.constant 0 : index
    %10 = vector.load %arg5[%c0_9, %c0_10] : memref<1x128xf32, #tpu.memory_space<vmem>>, vector<1x128xf32>
    %11 = vector.broadcast %10 : vector<1x128xf32> to vector<8x128xf32>
    %12 = arith.addf %9, %11 : vector<8x128xf32>
    %cst_11 = arith.constant 0.000000e+00 : f32
    %13 = vector.broadcast %cst_11 : f32 to vector<8x128xf32>
    %14 = arith.maximumf %12, %13 : vector<8x128xf32>
    %c0_12 = arith.constant 0 : index
    %c0_13 = arith.constant 0 : index
    %15 = vector.load %arg6[%c0_12, %c0_13] : memref<8x128xf32, #tpu.memory_space<vmem>>, vector<8x128xf32>
    tpu.vector_store %arg6[%c0_12, %c0_13], %14 {strides = array<i32>} : memref<8x128xf32, #tpu.memory_space<vmem>>, vector<8x128xf32>,
    return
  }
  func.func @transform_0(%arg0: i32) -> (i32, i32) {
    %c0_i32 = arith.constant 0 : i32
    %c0_i32_0 = arith.constant 0 : i32
    return %arg0, %c0_i32 : i32, i32
  }
  func.func @transform_1(%arg0: i32) -> (i32, i32) {
    %c0_i32 = arith.constant 0 : i32
    %c0_i32_0 = arith.constant 0 : i32
    %c0_i32_1 = arith.constant 0 : i32
    return %c0_i32, %c0_i32_0 : i32, i32
  }
  func.func @transform_2(%arg0: i32) -> (i32, i32) {
    %c0_i32 = arith.constant 0 : i32
    %c0_i32_0 = arith.constant 0 : i32
    %c0_i32_1 = arith.constant 0 : i32
    return %c0_i32, %c0_i32_0 : i32, i32
  }
  func.func @transform_3(%arg0: i32) -> (i32, i32) {
    %c0_i32 = arith.constant 0 : i32
    %c0_i32_0 = arith.constant 0 : i32
    %c0_i32_1 = arith.constant 0 : i32
    return %c0_i32, %c0_i32_0 : i32, i32
  }
  func.func @transform_4(%arg0: i32) -> (i32, i32) {
    %c0_i32 = arith.constant 0 : i32
    %c0_i32_0 = arith.constant 0 : i32
    %c0_i32_1 = arith.constant 0 : i32
    return %c0_i32, %c0_i32_0 : i32, i32
  }
  func.func @transform_5(%arg0: i32) -> (i32, i32) {
    %c0_i32 = arith.constant 0 : i32
    %c0_i32_0 = arith.constant 0 : i32
    return %arg0, %c0_i32 : i32, i32
  }
}

</mosaic_0001>

<bundles_post_ra>
// kernel: tpu_custom_call.1
= control target key start
LH: loop header
LB: loop body
LE: loop exit
PB: predicated region body
PF: predicated region fallthrough
CT: control target
= control target key end

     0   :  { %10 = vsyncpa [#allocation3], 0  ;;  %s556_s0 = inlined_call_operand.hbm [shape: f32[8,128], index: 0, kind: input, shape index: {}]   ;;  %s557_s1 = inlined_call_operand.hbm [shape: f32[128,128], index: 1, kind: input, shape index: {}]   ;;  %s558_s2 = inlined_call_operand.vmem [shape: f32[1,128], index: 2, kind: input, shape index: {}]   ;;  %s559_s3 = inlined_call_operand.hbm [shape: f32[128,128], index: 3, kind: input, shape index: {}]   ;;  %s560_s4 = inlined_call_operand.vmem [shape: f32[1,128], index: 4, kind: input, shape index: {}]   ;;  %s561_s5 = inlined_call_operand.hbm [shape: f32[8,128], index: 5, kind: output, shape index: {}]  }
   0x1   :  { %11 = vsyncpa [#allocation6], 0 }
   0x2   :  { %12 = vsyncpa [#allocation4], 0  ;;  %s466_s18 = smov [#allocation5]  }
   0x3   :  { %s28_s19 = sshll.u32 %s466_s18, 4  ;;  %s29_s19 = int_to_ptr.vmem [resolvable:$true] %s28_s19 }
   0x4   :  { %s388_s20 = scalar_lea.vmem %s29_s19, 2048  ;;  %p393_p1 = scmp.lt.s32.totalorder %s29_s19, %s29_s19 }
   0x5   :  { %p389_p0 = scmp.ne.s32.totalorder %s29_s19, %s388_s20  ;;  %p394_p2 = scmp.lt.s32.totalorder %s388_s20, %s388_s20 }
   0x7   :  { %p395_p3 = por %p394_p2, %p393_p1 }
   0x9   :  { %p396_p4 = pnand %p395_p3, %p389_p0 }
   0xb   :  { %399 = shalt.err (!%p396_p4)
}
   0xc   :  { %s467_s21 = smov 128   ;;  %s468_s22 = smov 8  }
   0xd   :  { %34 = dma.hbm_to_vmem [thread:$0]  %s557_s1, 2048, %s29_s19, [#allocation6], %s467_s21, %s467_s21, %s468_s22  }
   0xe   :  { %s469_s25 = smov [#allocation2]   ;;  %s470_s27 = smov [#allocation7]  }
   0xf   :  { %s19_s26 = sshll.u32 %s469_s25, 4  ;;  %s42_s28 = sshll.u32 %s470_s27, 4  ;;  %s20_s26 = int_to_ptr.vmem [resolvable:$true] %s19_s26  ;;  %s43_s28 = int_to_ptr.vmem [resolvable:$true] %s42_s28 }
  0x10   :  { %s408_s29 = scalar_lea.vmem %s20_s26, 128  ;;  %p413_p6 = scmp.lt.s32.totalorder %s20_s26, %s20_s26 }
  0x11   :  { %p409_p5 = scmp.ne.s32.totalorder %s20_s26, %s408_s29  ;;  %p414_p7 = scmp.lt.s32.totalorder %s408_s29, %s408_s29 }
  0x13   :  { %p415_p8 = por %p414_p7, %p413_p6 }
  0x15   :  { %p416_p9 = pnand %p415_p8, %p409_p5 }
  0x17   :  { %419 = shalt.err (!%p416_p9)
}
  0x18   :  { %22 = dma.hbm_to_vmem [thread:$0]  %s556_s0, 128, %s20_s26, [#allocation3]  }
  0x19   :  { %s428_s7 = scalar_lea.vmem %s43_s28, 2048  ;;  %p433_p11 = scmp.lt.s32.totalorder %s43_s28, %s43_s28 }
  0x1a   :  { %p429_p10 = scmp.ne.s32.totalorder %s43_s28, %s428_s7  ;;  %p434_p12 = scmp.lt.s32.totalorder %s428_s7, %s428_s7 }
  0x1c   :  { %p435_p13 = por %p434_p12, %p433_p11 }
  0x1e   :  { %p436_p0 = pnand %p435_p13, %p429_p10 }
  0x20   :  { %439 = shalt.err (!%p436_p0)
}
  0x21   :  { %48 = dma.hbm_to_vmem [thread:$0]  %s559_s3, 2048, %s43_s28, [#allocation6], %s467_s21, %s467_s21, %s468_s22  }
  0x22   :  { %460 = dma.done.wait [#allocation3], 128  }
  0x23   :  { %461 = vsyncadd [#allocation3], 4294967168 }
  0x24   :  { %462 = dma.done.wait [#allocation6], 4096  }
  0x25   :  { %463 = vsyncadd [#allocation6], 4294963200  ;;  %v471_v0 = vmov 0.0   ;;  %vm472_vm0 = vmmov 0   ;;  %v76_v1 = vld [vmem:[#allocation5 + $0x78] sm:$0xff]  ;;  %v75_v2 = vld [vmem:[#allocation5 + $0x70] sm:$0xff] }
  0x26   :  { %302 = vmatprep.subr.mxu0 %v471_v0  ;;  %334 = vmatprep.mubr.msk.f32.mxu0 %vm472_vm0, %v471_v0  ;;  %v74_v3 = vld [vmem:[#allocation5 + $0x68] sm:$0xff]  ;;  %v73_v4 = vld [vmem:[#allocation5 + $0x60] sm:$0xff]  ;;  %v170_v5 = vld [vmem:[#allocation7 + $0x78] sm:$0xff]  ;;  %s473_s11 = smov [#allocation8]  }
  0x27   :  { %337 = vmatprep.subr.mxu1 %v471_v0  ;;  %369 = vmatprep.mubr.msk.f32.mxu1 %vm472_vm0, %v471_v0  ;;  %v72_v6 = vld [vmem:[#allocation5 + $0x58] sm:$0xff]  ;;  %v169_v7 = vld [vmem:[#allocation7 + $0x70] sm:$0xff]  ;;  %v168_v8 = vld [vmem:[#allocation7 + $0x68] sm:$0xff]  ;;  %s256_s12 = sshll.u32 %s473_s11, 4  ;;  %s257_s12 = int_to_ptr.vmem [resolvable:$true] %s256_s12 }
  0x28   :  { %303 = vmatpush3.msra.mxu0 %v76_v1  ;;  %338 = vmatpush3.msra.mxu1 %v170_v5  ;;  %v71_v9 = vld [vmem:[#allocation5 + $0x50] sm:$0xff]  ;;  %v167_v10 = vld [vmem:[#allocation7 + $0x60] sm:$0xff]  ;;  %v70_v11 = vld [vmem:[#allocation5 + $0x48] sm:$0xff]  ;;  %s440_s13 = scalar_lea.vmem %s257_s12, 128  ;;  %p445_p2 = scmp.lt.s32.totalorder %s257_s12, %s257_s12 }
  0x29   :  { %304 = vmatprep.subr.mxu0 %v471_v0  ;;  %339 = vmatprep.subr.mxu1 %v471_v0  ;;  %v166_v12 = vld [vmem:[#allocation7 + $0x58] sm:$0xff]  ;;  %v69_v13 = vld [vmem:[#allocation5 + $0x40] sm:$0xff]  ;;  %v165_v14 = vld [vmem:[#allocation7 + $0x50] sm:$0xff]  ;;  %p441_p1 = scmp.ne.s32.totalorder %s257_s12, %s440_s13  ;;  %p446_p3 = scmp.lt.s32.totalorder %s440_s13, %s440_s13 }
  0x2a   :  { %305 = vmatpush3.msra.mxu0 %v75_v2  ;;  %340 = vmatpush3.msra.mxu1 %v169_v7  ;;  %v68_v15 = vld [vmem:[#allocation5 + $0x38] sm:$0xff]  ;;  %v164_v16 = vld [vmem:[#allocation7 + $0x48] sm:$0xff]  ;;  %v67_v17 = vld [vmem:[#allocation5 + $0x30] sm:$0xff] }
  0x2b   :  { %306 = vmatprep.subr.mxu0 %v471_v0  ;;  %341 = vmatprep.subr.mxu1 %v471_v0  ;;  %v163_v18 = vld [vmem:[#allocation7 + $0x40] sm:$0xff]  ;;  %v66_v19 = vld [vmem:[#allocation5 + $0x28] sm:$0xff]  ;;  %v162_v20 = vld [vmem:[#allocation7 + $0x38] sm:$0xff]  ;;  %p447_p4 = por %p446_p3, %p445_p2 }
  0x2c   :  { %307 = vmatpush3.msra.mxu0 %v74_v3  ;;  %342 = vmatpush3.msra.mxu1 %v168_v8  ;;  %v65_v21 = vld [vmem:[#allocation5 + $0x20] sm:$0xff]  ;;  %v161_v22 = vld [vmem:[#allocation7 + $0x30] sm:$0xff]  ;;  %v64_v23 = vld [vmem:[#allocation5 + $0x18] sm:$0xff] }
  0x2d   :  { %308 = vmatprep.subr.mxu0 %v471_v0  ;;  %343 = vmatprep.subr.mxu1 %v471_v0  ;;  %v160_v24 = vld [vmem:[#allocation7 + $0x28] sm:$0xff]  ;;  %v63_v25 = vld [vmem:[#allocation5 + $0x10] sm:$0xff]  ;;  %v159_v26 = vld [vmem:[#allocation7 + $0x20] sm:$0xff]  ;;  %p448_p5 = pnand %p447_p4, %p441_p1 }
  0x2e   :  { %309 = vmatpush3.msra.mxu0 %v73_v4  ;;  %344 = vmatpush3.msra.mxu1 %v167_v10  ;;  %v62_v27 = vld [vmem:[#allocation5 + $0x8] sm:$0xff]  ;;  %v158_v28 = vld [vmem:[#allocation7 + $0x18] sm:$0xff]  ;;  %v61_v29 = vld [vmem:[#allocation5] sm:$0xff] }
  0x2f   :  { %310 = vmatprep.subr.mxu0 %v471_v0  ;;  %345 = vmatprep.subr.mxu1 %v471_v0  ;;  %v60_v30 = vld [vmem:[#allocation2] sm:$0xff]  ;;  %v157_v31 = vld [vmem:[#allocation7 + $0x10] sm:$0xff]  ;;  %v156_v32 = vld [vmem:[#allocation7 + $0x8] sm:$0xff] }
  0x30   :  { %311 = vmatpush3.msra.mxu0 %v72_v6  ;;  %346 = vmatpush3.msra.mxu1 %v166_v12  ;;  %v155_v33 = vld [vmem:[#allocation7] sm:$0xff]  ;;  %v266_v34 = vld [vmem:[%s558_s2] ss:$0 sm:$0xff] }
  0x31   :  { %312 = vmatprep.subr.mxu0 %v471_v0  ;;  %347 = vmatprep.subr.mxu1 %v471_v0  ;;  %v267_v39 = vld [vmem:[%s560_s4] ss:$0 sm:$0xff] }
  0x32   :  { %313 = vmatpush3.msra.mxu0 %v71_v9  ;;  %348 = vmatpush3.msra.mxu1 %v165_v14 }
  0x33   :  { %314 = vmatprep.subr.mxu0 %v471_v0  ;;  %349 = vmatprep.subr.mxu1 %v471_v0 }
  0x34   :  { %315 = vmatpush3.msra.mxu0 %v70_v11  ;;  %350 = vmatpush3.msra.mxu1 %v164_v16 }
  0x35   :  { %316 = vmatprep.subr.mxu0 %v471_v0  ;;  %351 = vmatprep.subr.mxu1 %v471_v0 }
  0x36   :  { %317 = vmatpush3.msra.mxu0 %v69_v13  ;;  %352 = vmatpush3.msra.mxu1 %v163_v18 }
  0x37   :  { %318 = vmatprep.subr.mxu0 %v471_v0  ;;  %353 = vmatprep.subr.mxu1 %v471_v0 }
  0x38   :  { %319 = vmatpush3.msra.mxu0 %v68_v15  ;;  %354 = vmatpush3.msra.mxu1 %v162_v20 }
  0x39   :  { %320 = vmatprep.subr.mxu0 %v471_v0  ;;  %355 = vmatprep.subr.mxu1 %v471_v0 }
  0x3a   :  { %321 = vmatpush3.msra.mxu0 %v67_v17  ;;  %356 = vmatpush3.msra.mxu1 %v161_v22 }
  0x3b   :  { %322 = vmatprep.subr.mxu0 %v471_v0  ;;  %357 = vmatprep.subr.mxu1 %v471_v0 }
  0x3c   :  { %323 = vmatpush3.msra.mxu0 %v66_v19  ;;  %358 = vmatpush3.msra.mxu1 %v160_v24 }
  0x3d   :  { %324 = vmatprep.subr.mxu0 %v471_v0  ;;  %359 = vmatprep.subr.mxu1 %v471_v0 }
  0x3e   :  { %325 = vmatpush3.msra.mxu0 %v65_v21  ;;  %360 = vmatpush3.msra.mxu1 %v159_v26 }
  0x3f   :  { %326 = vmatprep.subr.mxu0 %v471_v0  ;;  %361 = vmatprep.subr.mxu1 %v471_v0 }
  0x40   :  { %327 = vmatpush3.msra.mxu0 %v64_v23  ;;  %362 = vmatpush3.msra.mxu1 %v158_v28 }
  0x41   :  { %328 = vmatprep.subr.mxu0 %v471_v0  ;;  %363 = vmatprep.subr.mxu1 %v471_v0 }
  0x42   :  { %329 = vmatpush3.msra.mxu0 %v63_v25  ;;  %364 = vmatpush3.msra.mxu1 %v157_v31 }
  0x43   :  { %330 = vmatprep.subr.mxu0 %v471_v0  ;;  %365 = vmatprep.subr.mxu1 %v471_v0 }
  0x44   :  { %331 = vmatpush3.msra.mxu0 %v62_v27  ;;  %366 = vmatpush3.msra.mxu1 %v156_v32 }
  0x45   :  { %332 = vmatprep.subr.mxu0 %v471_v0  ;;  %367 = vmatprep.subr.mxu1 %v471_v0 }
  0x46   :  { %333 = vmatpush3.msra.mxu0 %v61_v29  ;;  %368 = vmatpush3.msra.mxu1 %v155_v33 }
  0x47   :  { %335 = vmatmul.mubr.f32.vlgmr.msra.gmra.mxu0 %v60_v30 }
 0x107   :  { %v150_v35 = vpop.f32.mrf.mxu0 }
 0x108   :  { %v151_v36 = vadd.f32 %v266_v34, %v150_v35 }
 0x109   :  { %v336_v37 = vpop.f32.mrf.mxu0 }
 0x10a   :  { %v154_v38 = vmax.f32 %v151_v36, 0.0 }
 0x10c   :  { %370 = vmatmul.mubr.f32.vlgmr.msra.gmra.mxu1 %v154_v38 }
 0x1cc   :  { %v244_v40 = vpop.f32.mrf.mxu1 }
 0x1cd   :  { %v245_v41 = vadd.f32 %v267_v39, %v244_v40 }
 0x1ce   :  { %v371_v42 = vpop.f32.mrf.mxu1 }
 0x1cf   :  { %v248_v43 = vmax.f32 %v245_v41, 0.0 }
 0x1d1   :  { %249 = vst [vmem:[#allocation8] sm:$0xff] %v248_v43 }
 0x1d2   :  { %451 = shalt.err (!%p448_p5)
}
 0x1d3   :  { %259 = dma.vmem_to_hbm [thread:$0]  %s257_s12, 128, %s561_s5, [#allocation4]  }
 0x1d4   :  { %464 = dma.done.wait [#allocation4], 128  }
 0x1d5   :  { %465 = vsyncadd [#allocation4], 4294967168 }
 0x1d6   :  { %263 = vsyncpa [#allocation3], 1 }
 0x1d7   :  { %264 = vsyncpa [#allocation6], 1 }
 0x1d8   :  { %265 = vsyncpa [#allocation4], 1 }

</bundles_post_ra>
